<compile_context>
chip_gen: v7x
topology: tpu7x:2x2x1
jax: 0.10.0
libtpu: 0.0.40
codegen_flags: <defaults>
</compile_context>

<pallas_src>
import jax
import jax.numpy as jnp
from jax.experimental import pallas as pl
from jax.experimental.pallas import tpu as pltpu

EPS = 1e-5


def _attn_kernel(x_ref, w_ref, fb_ref, o_ref):
    """One BN group per grid step: BatchNorm1d (training stats) + Linear.

    x_ref  : [1, B, D_in]    one group's rows (sublanes) x features (lanes)
    w_ref  : [D_in, D_out]   Linear weight, pre-transposed, gamma folded in
    fb_ref : [1, D_out]      fused bias = beta_bn @ W + b
    o_ref  : [1, B, D_out]   true-width output tile
    """
    x = x_ref[0]
    if x.dtype != jnp.float32:          # trace-time gate; no-op for f32 inputs
        x = x.astype(jnp.float32)

    # BatchNorm1d training-mode statistics over the group's batch axis (biased variance),
    # via E[x^2] - mean^2 (one fewer full [B, D_in] pass).  Clamp guards against f32
    # cancellation producing a tiny negative variance -> NaN in rsqrt.
    mean = jnp.mean(x, axis=0, keepdims=True)            # [1, D_in]
    mean_sq = jnp.mean(x * x, axis=0, keepdims=True)     # [1, D_in]
    var = jnp.maximum(mean_sq - mean * mean, 0.0)

    # gamma is already folded into w_ref, beta_bn into fb_ref; only inv_std remains.
    # rsqrt goes to the EUP slot (co-issues with the VPU work).
    inv_std = jax.lax.rsqrt(var + EPS)                    # [1, D_in]
    # NOTE: for large B, replace (x - mean) * inv_std with (x * inv_std) @ W minus a
    # [1,D_in]x[D_in,D_out] correction folded into the bias to save one [B,D_in] VPU pass.
    x_norm = (x - mean) * inv_std                         # [B, D_in]

    # Projection.  At B=8 this is one MXU pass; if B scales, tile M to 256 (v6e/v7x) /
    # 128 (v5e) and cast the dot operands to bf16 (keep preferred_element_type=f32).
    y = jnp.dot(x_norm, w_ref[...], preferred_element_type=jnp.float32)
    o_ref[0] = (y + fb_ref[...]).astype(o_ref.dtype)


def prepare_params(gamma, beta_bn, weight, bias):
    """One-time parameter prep (do once, NOT per forward call):
      * fold BatchNorm gamma into the linear weight: W_g[i,:] = gamma[i] * W[i,:]
      * fold BatchNorm beta into the linear bias:    fused_bias = beta_bn @ W + bias
    weight: [D_in, D_out] (already transposed from torch's [D_out, D_in]).
    Returns (w_gamma, fused_bias).
    """
    w_gamma = weight * gamma.reshape(-1, 1)               # [D_in, D_out]
    fused_bias = beta_bn @ weight + bias                  # [1, D_out]  (unscaled W!)
    return w_gamma, fused_bias


def simple_linear_projection_attention(x, w_gamma, fused_bias):
    """x: [B, D_in] (single instance) or [G, B, D_in] (G independent BN groups).

    Each group of B rows is one BatchNorm batch; all groups run in one pallas_call
    with grid=(G,) so launch/DMA overhead is amortized.
    """
    squeeze = x.ndim == 2
    if squeeze:
        x = x[None]                                        # [1, B, D_in]
    G, B, d_in = x.shape
    d_out = w_gamma.shape[1]

    out = pl.pallas_call(
        _attn_kernel,
        out_shape=jax.ShapeDtypeStruct((G, B, d_out), jnp.float32),
        grid=(G,),
        in_specs=[
            pl.BlockSpec((1, B, d_in), lambda g: (g, 0, 0)),
            pl.BlockSpec((d_in, d_out), lambda g: (0, 0)),   # resident across grid
            pl.BlockSpec((1, d_out), lambda g: (0, 0)),      # resident across grid
        ],
        out_specs=pl.BlockSpec((1, B, d_out), lambda g: (g, 0, 0)),
        compiler_params=pltpu.CompilerParams(
            dimension_semantics=("parallel",)),              # shards groups over v7x's 2 TCs
    )(x, w_gamma, fused_bias)

    return out[0] if squeeze else out


def _reference(x, gamma, beta_bn, weight, bias):
    """Pure-JAX reference: BatchNorm1d (training mode, biased var) + Linear."""
    mean = jnp.mean(x, axis=0, keepdims=True)
    var = jnp.mean((x - mean) ** 2, axis=0, keepdims=True)
    xn = (x - mean) / jnp.sqrt(var + EPS) * gamma + beta_bn
    return xn @ weight + bias


if __name__ == "__main__":
    # Module hyperparameters (small, consistent with the forward pass).
    B = 8
    attn_input_img_size = 32   # D_in
    text_features_size = 16    # D_out
    G = 4                      # independent BN groups batched into one pallas_call

    key = jax.random.PRNGKey(0)
    k_x, k_xb, k_w, k_b, k_g, k_bb = jax.random.split(key, 6)

    # Deterministic synthetic parameters (shapes match the PyTorch module; gamma/beta
    # made non-trivial so the folded-weight / folded-bias path is actually exercised).
    x = jax.random.normal(k_x, (B, attn_input_img_size), dtype=jnp.float32)
    x_groups = jax.random.normal(k_xb, (G, B, attn_input_img_size), dtype=jnp.float32)
    bound = 1.0 / (attn_input_img_size ** 0.5)
    weight = jax.random.uniform(
        k_w, (attn_input_img_size, text_features_size),
        minval=-bound, maxval=bound, dtype=jnp.float32)                 # fc.weight (transposed)
    bias = jax.random.uniform(
        k_b, (1, text_features_size), minval=-bound, maxval=bound,
        dtype=jnp.float32)                                              # fc.bias
    gamma = 1.0 + 0.1 * jax.random.normal(
        k_g, (1, attn_input_img_size), dtype=jnp.float32)               # BatchNorm1d.weight
    beta_bn = 0.1 * jax.random.normal(
        k_bb, (1, attn_input_img_size), dtype=jnp.float32)              # BatchNorm1d.bias

    # One-time parameter prep (gamma/beta folds).
    w_g, fb = prepare_params(gamma, beta_bn, weight, bias)

    # Single-instance call (matches the original module's forward exactly).
    out = simple_linear_projection_attention(x, w_g, fb)
    out = jax.block_until_ready(out)
    ref = _reference(x, gamma, beta_bn, weight, bias)
    assert out.shape == (B, text_features_size)
    assert jnp.allclose(out, ref, atol=1e-4, rtol=1e-4), "single-instance mismatch vs reference"

    # Batched call: G independent instances in ONE pallas_call (the overhead-amortizing path).
    out_b = simple_linear_projection_attention(x_groups, w_g, fb)
    out_b = jax.block_until_ready(out_b)
    ref_b = jnp.stack([_reference(x_groups[g], gamma, beta_bn, weight, bias) for g in range(G)])
    assert out_b.shape == (G, B, text_features_size)
    assert jnp.allclose(out_b, ref_b, atol=1e-4, rtol=1e-4), "batched mismatch vs reference"

    print("KERNEL_OK")
</pallas_src>

<mosaic_0001>
module attributes {stable_mosaic.version = 11 : i64} {
  func.func @_attn_kernel(%arg0: i32, %arg1: memref<1x8x32xf32, #tpu.memory_space<vmem>>, %arg2: memref<32x16xf32, #tpu.memory_space<vmem>>, %arg3: memref<1x16xf32, #tpu.memory_space<vmem>>, %arg4: memref<1x8x16xf32, #tpu.memory_space<vmem>>) attributes {dimension_semantics = [#tpu.dimension_semantics<parallel>], iteration_bounds = array<i64: 1>, scalar_prefetch = 0 : i64, scratch_operands = 0 : i64, tpu.core_type = #tpu.core_type<tc>, window_params = [{transform_indices = @transform_0, window_bounds = array<i64: 1, 8, 32>}, {pipeline_mode = #tpu.pipeline_mode<synchronous>, transform_indices = @transform_1, window_bounds = array<i64: 32, 16>}, {pipeline_mode = #tpu.pipeline_mode<synchronous>, transform_indices = @transform_2, window_bounds = array<i64: 1, 16>}, {transform_indices = @transform_3, window_bounds = array<i64: 1, 8, 16>}]} {
    %c0 = arith.constant 0 : index
    %c0_0 = arith.constant 0 : index
    %c0_1 = arith.constant 0 : index
    %0 = vector.load %arg1[%c0, %c0_0, %c0_1] : memref<1x8x32xf32, #tpu.memory_space<vmem>>, vector<1x8x32xf32>
    %1 = vector.shape_cast %0 : vector<1x8x32xf32> to vector<8x32xf32>
    %cst = arith.constant dense<0.000000e+00> : vector<32xf32>
    %2 = vector.multi_reduction <add>, %1, %cst [0] : vector<8x32xf32> to vector<32xf32>
    %3 = vector.shape_cast %2 : vector<32xf32> to vector<1x32xf32>
    %cst_2 = arith.constant 8.000000e+00 : f32
    %4 = vector.broadcast %cst_2 : f32 to vector<1x32xf32>
    %5 = arith.divf %3, %4 : vector<1x32xf32>
    %6 = arith.mulf %1, %1 : vector<8x32xf32>
    %cst_3 = arith.constant dense<0.000000e+00> : vector<32xf32>
    %7 = vector.multi_reduction <add>, %6, %cst_3 [0] : vector<8x32xf32> to vector<32xf32>
    %8 = vector.shape_cast %7 : vector<32xf32> to vector<1x32xf32>
    %cst_4 = arith.constant 8.000000e+00 : f32
    %9 = vector.broadcast %cst_4 : f32 to vector<1x32xf32>
    %10 = arith.divf %8, %9 : vector<1x32xf32>
    %11 = arith.mulf %5, %5 : vector<1x32xf32>
    %12 = arith.subf %10, %11 : vector<1x32xf32>
    %cst_5 = arith.constant 0.000000e+00 : f32
    %13 = vector.broadcast %cst_5 : f32 to vector<1x32xf32>
    %14 = arith.maximumf %12, %13 : vector<1x32xf32>
    %cst_6 = arith.constant 9.99999974E-6 : f32
    %15 = vector.broadcast %cst_6 : f32 to vector<1x32xf32>
    %16 = arith.addf %14, %15 : vector<1x32xf32>
    %17 = math.rsqrt %16 : vector<1x32xf32>
    %18 = vector.broadcast %5 : vector<1x32xf32> to vector<8x32xf32>
    %19 = arith.subf %1, %18 : vector<8x32xf32>
    %20 = vector.broadcast %17 : vector<1x32xf32> to vector<8x32xf32>
    %21 = arith.mulf %19, %20 : vector<8x32xf32>
    %c0_7 = arith.constant 0 : index
    %c0_8 = arith.constant 0 : index
    %22 = vector.load %arg2[%c0_7, %c0_8] : memref<32x16xf32, #tpu.memory_space<vmem>>, vector<32x16xf32>
    %cst_9 = arith.constant dense<0.000000e+00> : vector<8x16xf32>
    %23 = tpu.matmul %21, %22, %cst_9 {dimension_numbers = #tpu.dot_dimension_numbers<[1], [0], [0], [1], [0, 0, 1, 1], [], []>} : vector<8x32xf32>, vector<32x16xf32>, vector<8x16xf32> -> vector<8x16xf32>
    %c0_10 = arith.constant 0 : index
    %c0_11 = arith.constant 0 : index
    %24 = vector.load %arg3[%c0_10, %c0_11] : memref<1x16xf32, #tpu.memory_space<vmem>>, vector<1x16xf32>
    %25 = vector.broadcast %24 : vector<1x16xf32> to vector<8x16xf32>
    %26 = arith.addf %23, %25 : vector<8x16xf32>
    %c0_12 = arith.constant 0 : index
    %c0_13 = arith.constant 0 : index
    %c0_14 = arith.constant 0 : index
    %27 = vector.load %arg4[%c0_12, %c0_13, %c0_14] : memref<1x8x16xf32, #tpu.memory_space<vmem>>, vector<1x8x16xf32>
    %28 = vector.shape_cast %27 : vector<1x8x16xf32> to vector<8x16xf32>
    %29 = vector.shape_cast %26 : vector<8x16xf32> to vector<1x8x16xf32>
    tpu.vector_store %arg4[%c0_12, %c0_13, %c0_14], %29 {strides = array<i32>} : memref<1x8x16xf32, #tpu.memory_space<vmem>>, vector<1x8x16xf32>,
    return
  }
  func.func @transform_0(%arg0: i32) -> (i32, i32, i32) {
    %c0_i32 = arith.constant 0 : i32
    %c0_i32_0 = arith.constant 0 : i32
    %c0_i32_1 = arith.constant 0 : i32
    return %arg0, %c0_i32, %c0_i32_0 : i32, i32, i32
  }
  func.func @transform_1(%arg0: i32) -> (i32, i32) {
    %c0_i32 = arith.constant 0 : i32
    %c0_i32_0 = arith.constant 0 : i32
    %c0_i32_1 = arith.constant 0 : i32
    return %c0_i32, %c0_i32_0 : i32, i32
  }
  func.func @transform_2(%arg0: i32) -> (i32, i32) {
    %c0_i32 = arith.constant 0 : i32
    %c0_i32_0 = arith.constant 0 : i32
    %c0_i32_1 = arith.constant 0 : i32
    return %c0_i32, %c0_i32_0 : i32, i32
  }
  func.func @transform_3(%arg0: i32) -> (i32, i32, i32) {
    %c0_i32 = arith.constant 0 : i32
    %c0_i32_0 = arith.constant 0 : i32
    %c0_i32_1 = arith.constant 0 : i32
    return %arg0, %c0_i32, %c0_i32_0 : i32, i32, i32
  }
}

</mosaic_0001>

<bundles_post_ra>
// kernel: tpu_custom_call.1
= control target key start
LH: loop header
LB: loop body
LE: loop exit
PB: predicated region body
PF: predicated region fallthrough
CT: control target
= control target key end

     0   :  { %v196_v3 = vmov 0.0|0.0   ;;  %vm197_vm0 = vmmov 0   ;;  %v198_v6 = vmov 0.0   ;;  %vm16_vm1 = vcmask 261120   ;;  %s253_s0 = inlined_call_operand.vmem [shape: f32[1,8,32], index: 0, kind: input, shape index: {}]   ;;  %s254_s1 = inlined_call_operand.vmem [shape: f32[32,16], index: 1, kind: input, shape index: {}]   ;;  %s255_s2 = inlined_call_operand.vmem [shape: f32[1,16], index: 2, kind: input, shape index: {}]   ;;  %s256_s3 = inlined_call_operand.hbm [shape: f32[1,8,16], index: 3, kind: output, shape index: {}]  }
   0x1   :  { %v42_v0 = vld [vmem:[%s254_s1] sm:$0xff]  ;;  %v43_v1 = vld [vmem:[%s254_s1 + $0x8] sm:$0xff]  ;;  %v44_v2 = vld [vmem:[%s254_s1 + $0x10] sm:$0xff]  ;;  %160 = vmatprep.subr.bf16.mxu0 %v196_v3  ;;  %157 = vmatprep.mubr.msk.f32.mxu0 %vm197_vm0, %v198_v6 }
   0x2   :  { %v161_v4 = vpack.c.bf16 %v43_v1, %v42_v0  ;;  %v45_v5 = vld [vmem:[%s254_s1 + $0x18] sm:$0xff]  ;;  %v15_v7 = vld [vmem:[%s253_s0] sm:$0xff] }
   0x3   :  { %v17_v8 = vsel %vm16_vm1, %v15_v7, 0.0  ;;  %v26_v9 = vmul.f32 %v15_v7, %v15_v7 }
   0x4   :  { %8 = vsyncpa [#allocation3], 0  ;;  %162 = vmatpush3.bf16.msra.mxu0 %v161_v4  ;;  %v164_v10 = vpack.c.bf16 %v45_v5, %v44_v2  ;;  %v18_v11 = vrot.slane %v17_v8, 4  ;;  %v142_v33 = vld [vmem:[%s255_s2] ss:$0 sm:$0xff]  ;;  %s199_s22 = smov [#allocation2]  }
   0x5   :  { %163 = vmatprep.subr.bf16.mxu0 %v196_v3  ;;  %v27_v12 = vsel %vm16_vm1, %v26_v9, 0.0  ;;  %s134_s23 = sshll.u32 %s199_s22, 4  ;;  %vm126_vm2 = vcmask 130048   ;;  %s135_s23 = int_to_ptr.vmem [resolvable:$true] %s134_s23 }
   0x6   :  { %v19_v13 = vadd.f32 %v18_v11, %v17_v8  ;;  %v28_v14 = vrot.slane %v27_v12, 4  ;;  %s172_s24 = scalar_lea.vmem %s135_s23, 128  ;;  %p177_p1 = scmp.lt.s32.totalorder %s135_s23, %s135_s23 }
   0x7   :  { %p173_p0 = scmp.ne.s32.totalorder %s135_s23, %s172_s24  ;;  %p178_p2 = scmp.lt.s32.totalorder %s172_s24, %s172_s24 }
   0x8   :  { %165 = vmatpush3.bf16.msra.mxu0 %v164_v10  ;;  %v20_v15 = vrot.slane %v19_v13, 2  ;;  %v29_v16 = vadd.f32 %v28_v14, %v27_v12 }
   0x9   :  { %p179_p3 = por %p178_p2, %p177_p1 }
   0xa   :  { %v21_v17 = vadd.f32 %v20_v15, %v19_v13  ;;  %v30_v18 = vrot.slane %v29_v16, 2 }
   0xb   :  { %p180_p4 = pnand %p179_p3, %p173_p0 }
   0xc   :  { %v22_v19 = vrot.slane %v21_v17, 1  ;;  %v31_v20 = vadd.f32 %v30_v18, %v29_v16 }
   0xe   :  { %v23_v21 = vadd.f32 %v22_v19, %v21_v17  ;;  %v32_v22 = vrot.slane %v31_v20, 1 }
  0x10   :  { %v25_v23 = vmul.f32 0.125, %v23_v21  ;;  %v33_v24 = vadd.f32 %v32_v22, %v31_v20 }
  0x12   :  { %v34_v25 = vmul.f32 0.125, %v33_v24  ;;  %v35_v26 = vmul.f32 %v25_v23, %v25_v23  ;;  %v40_v30 = vsub.f32 %v15_v7, %v25_v23 }
  0x14   :  { %v36_v27 = vsub.f32 %v34_v25, %v35_v26 }
  0x16   :  { %v37_v28 = vmax.f32 %v36_v27, 0.0 }
  0x18   :  { %v38_v29 = vadd.f32 1e-05, %v37_v28 }
  0x1a   :  { %170 = vrsqrt.f32 %v38_v29 }
  0x24   :  { %v171_v31 = vpop.eup %170 }
  0x25   :  { %v41_v32 = vmul.f32 %v171_v31, %v40_v30 }
  0x27   :  { %158 = vmatmul.mubr.msk.f32.vlgmr.msra.gmra.mrb[0].mxu0 %vm16_vm1, %v41_v32 }
  0xfa   :  { %v122_v34 = vpop.f32.mrb[0].mxu0 }
  0xfb   :  { %v123_v35 = vadd.f32 %v142_v33, %v122_v34  ;;  %v159_v36 = vpop.f32.mrb[1].mxu0 }
  0xfd   :  { %127 = vst.msk [vmem:[#allocation2] sm:$0xff] %vm126_vm2, %v123_v35 }
  0xfe   :  { %183 = shalt.err (!%p180_p4)
}
  0xff   :  { %s184_s27 = scalar_lea.hbm %s256_s3, 128 }
 0x100   :  { %p185_p5 = scmp.ne.s32.totalorder %s256_s3, %s184_s27  ;;  %p188_p6 = scmp.lt.u32.totalorder %s184_s27, %s256_s3 }
 0x102   :  { %p190_p7 = pnand %p188_p6, %p185_p5 }
 0x104   :  { %193 = shalt.err (!%p190_p7)
}
 0x105   :  { %137 = dma.vmem_to_hbm [thread:$0]  %s135_s23, 128, %s256_s3, [#allocation3]  }
 0x106   :  { %194 = dma.done.wait [#allocation3], 128  }
 0x107   :  { %195 = vsyncadd [#allocation3], 4294967168 }
 0x108   :  { %141 = vsyncpa [#allocation3], 1 }

</bundles_post_ra>
